<compile_context>
chip_gen: v7x
topology: tpu7x:2x2x1
jax: 0.10.0
libtpu: 0.0.40
codegen_flags: <defaults>
</compile_context>

<pallas_src>
import math
import functools

import jax
import jax.numpy as jnp
import numpy as np
from jax import lax
from jax.experimental import pallas as pl
from jax.experimental.pallas import tpu as pltpu

# Default (non-trainable) lambda mixture weights from DGTNet.py
_L_ATT, _L1, _L2, _L3, _L4, _L5 = 0.3, 0.0999, 0.0801, 0.06, 0.0399, 0.0201
_L_ADJ = 1.0 - _L_ATT - _L1 - _L2 - _L3 - _L4 - _L5
LAMBDAS = (_L_ATT, _L1, _L2, _L3, _L4, _L5, _L_ADJ)
MASK_NEG_INF = 1.0e12            # matches `inf=1000000000000.0` in the reference
VMEM_LIMIT = 40 * 1024 * 1024    # scoped-VMEM cap with headroom on v7x (64 MiB physical)


# ---------------------------------------------------------------------------
# Kernel 1: dense linear layer  y = x @ W_t + b   (nn.Linear, W_t pre-transposed bf16)
# Row-tiled (tm up to 1024) so it pipelines for large B*S; bf16 MXU, f32 accumulate.
# ---------------------------------------------------------------------------
def _linear_kernel(x_ref, wt_ref, b_ref, o_ref):
    x = x_ref[...].astype(jnp.bfloat16)
    y = jnp.dot(x, wt_ref[...], preferred_element_type=jnp.float32)
    o_ref[...] = (y + b_ref[...]).astype(o_ref.dtype)


def pallas_linear(x, w_t_bf16, b, out_dtype=jnp.float32, row_block=1024):
    """x: (N, d_in) f32; w_t_bf16: (d_in, d_out) PRE-transposed bf16; b: (d_out,) f32."""
    n, d_in = x.shape
    d_out = w_t_bf16.shape[1]
    tm = n if n <= row_block else row_block
    return pl.pallas_call(
        _linear_kernel,
        out_shape=jax.ShapeDtypeStruct((n, d_out), out_dtype),
        grid=(pl.cdiv(n, tm),),
        in_specs=[pl.BlockSpec((tm, d_in), lambda i: (i, 0)),
                  pl.BlockSpec((d_in, d_out), lambda i: (0, 0)),
                  pl.BlockSpec((1, d_out), lambda i: (0, 0))],
        out_specs=pl.BlockSpec((tm, d_out), lambda i: (i, 0)),
        compiler_params=pltpu.CompilerParams(
            dimension_semantics=("parallel",),
            vmem_limit_bytes=VMEM_LIMIT),
    )(x, w_t_bf16, b.reshape(1, d_out))


# ---------------------------------------------------------------------------
# Kernel 2: fused attention core, one (batch, query-row-tile) per grid step.
#   p_base   = sum_i lambda_i*softmax(-masked_imf_i) + lambda_adj*adj/(rowsum+eps)
#   acc      = p_base @ V_all                              (one wide MXU matmul)
#   per head acc[:, h] += (lambda_att*softmax(mask(QK^T/sqrt(d_k)))) @ V_h
#   out_tile = acc @ W_out^T + b_out                       (fused output projection)
# ---------------------------------------------------------------------------
def _fused_attention_kernel(q_ref, k_ref, v_ref, imf_ref, adj_ref, mask_ref,
                            wo_ref, bo_ref, o_ref, acc_ref, *,
                            h, d_k, lambdas, neg_inf, eps):
    masked0 = mask_ref[0] == 0.0                              # (1, S) key-position mask

    # ---- head-invariant probability base (f32, incremental accumulation) ----
    adj = adj_ref[0].astype(jnp.float32)                      # (tq, S)
    inv_adj = pl.reciprocal(jnp.sum(adj, axis=-1, keepdims=True) + eps, approx=False)
    p_base = (lambdas[6] * adj) * inv_adj
    for i in range(5):                                        # at most two (tq,S) live
        neg = jnp.where(masked0, -jnp.inf, -imf_ref[0, i].astype(jnp.float32))
        neg = neg - jnp.max(neg, axis=-1, keepdims=True)
        e = jnp.exp(neg)
        p = e * pl.reciprocal(jnp.sum(e, axis=-1, keepdims=True), approx=False)
        p_base = p_base + lambdas[1 + i] * p

    # ---- p_base @ V over the FULL d_model width (single wide MXU matmul) ----
    v_all = v_ref[0].astype(jnp.bfloat16)                     # (S, d_model)
    acc_ref[...] = jnp.dot(p_base.astype(jnp.bfloat16), v_all,
                           preferred_element_type=jnp.float32)

    # ---- per-head attention: only the lambda_att * p_attn @ V_h term ----
    scale = 1.0 / math.sqrt(d_k)
    q_all = (q_ref[0].astype(jnp.float32) * scale).astype(jnp.bfloat16)   # scale folded
    k_all = k_ref[0].astype(jnp.bfloat16)
    lam_att = lambdas[0]
    for hd in range(h):
        lo, hi = hd * d_k, (hd + 1) * d_k
        # Contract last axes of q_h and k_h directly (no materialized k.T).
        s = lax.dot_general(q_all[:, lo:hi], k_all[:, lo:hi],
                            (((1,), (1,)), ((), ())),
                            preferred_element_type=jnp.float32)           # (tq, S)
        s = jnp.where(masked0, -neg_inf, s)
        s = s - jnp.max(s, axis=-1, keepdims=True)
        e = jnp.exp(s)
        # lambda_att folded into the (approx, EUP-slot) reciprocal.
        p_attn = e * (lam_att * pl.reciprocal(jnp.sum(e, axis=-1, keepdims=True),
                                              approx=True))
        acc_ref[:, lo:hi] += jnp.dot(p_attn.astype(jnp.bfloat16), v_all[:, lo:hi],
                                     preferred_element_type=jnp.float32)

    # ---- fused output projection + single lane-dense store ----
    x = acc_ref[...].astype(jnp.bfloat16)                     # (tq, d_model)
    y = jnp.dot(x, wo_ref[...], preferred_element_type=jnp.float32) + bo_ref[...]
    o_ref[0] = y.astype(o_ref.dtype)


def pallas_fused_attention(q, k, v, adj, imf_stack, mask3, wo_t_bf16, bo,
                           h, lambdas, row_block=256, eps=1e-6):
    """q/k/v: (B,S,d_model); adj: (B,S,S); imf_stack: (B,5,S,S); mask3: (B,1,S)."""
    B, S, d_model = q.shape
    d_k = d_model // h
    tq = S if S <= row_block else row_block
    kernel = functools.partial(_fused_attention_kernel, h=h, d_k=d_k,
                               lambdas=lambdas, neg_inf=MASK_NEG_INF, eps=eps)
    return pl.pallas_call(
        kernel,
        out_shape=jax.ShapeDtypeStruct((B, S, d_model), jnp.float32),
        grid=(B, pl.cdiv(S, tq)),
        in_specs=[
            pl.BlockSpec((1, tq, d_model), lambda b, r: (b, r, 0)),   # Q row tile
            pl.BlockSpec((1, S, d_model), lambda b, r: (b, 0, 0)),    # K full
            pl.BlockSpec((1, S, d_model), lambda b, r: (b, 0, 0)),    # V full
            pl.BlockSpec((1, 5, tq, S), lambda b, r: (b, 0, r, 0)),   # 5 IMF row tiles
            pl.BlockSpec((1, tq, S), lambda b, r: (b, r, 0)),         # adj row tile
            pl.BlockSpec((1, 1, S), lambda b, r: (b, 0, 0)),          # key mask
            pl.BlockSpec((d_model, d_model), lambda b, r: (0, 0)),    # W_out^T resident
            pl.BlockSpec((1, d_model), lambda b, r: (0, 0)),          # b_out resident
        ],
        out_specs=pl.BlockSpec((1, tq, d_model), lambda b, r: (b, r, 0)),
        scratch_shapes=[pltpu.VMEM((tq, d_model), jnp.float32)],
        compiler_params=pltpu.CompilerParams(
            dimension_semantics=("parallel", "parallel"),
            vmem_limit_bytes=VMEM_LIMIT),
    )(q, k, v, imf_stack, adj, mask3, wo_t_bf16, bo.reshape(1, d_model))


# ---------------------------------------------------------------------------
# Full forward (glue in plain JAX, hot paths in Pallas).  No head transposes,
# no intermediate HBM round trips beyond the q/k/v projections.
# ---------------------------------------------------------------------------
def prepare_params(h, weights, biases):
    """weights[i]: (d_out, d_in) torch nn.Linear layout.  Transposed + bf16-cast ONCE."""
    return {"h": h,
            "wt_bf16": [jnp.asarray(w).T.astype(jnp.bfloat16) for w in weights],
            "b": [jnp.asarray(b, jnp.float32) for b in biases]}


def ts_mha_forward(params, Query, Key, Value, adj_matrix, imf_stack, mask):
    """imf_stack: (B, 5, S, S) pre-stacked IMF matrices (batch outermost)."""
    B, S, d_model = Query.shape
    h = params["h"]

    # Q/K/V projections emitted directly in bf16 (they are MXU operands downstream).
    q = pallas_linear(Query.reshape(B * S, d_model), params["wt_bf16"][0],
                      params["b"][0], out_dtype=jnp.bfloat16).reshape(B, S, d_model)
    k = pallas_linear(Key.reshape(B * S, d_model), params["wt_bf16"][1],
                      params["b"][1], out_dtype=jnp.bfloat16).reshape(B, S, d_model)
    v = pallas_linear(Value.reshape(B * S, d_model), params["wt_bf16"][2],
                      params["b"][2], out_dtype=jnp.bfloat16).reshape(B, S, d_model)

    mask3 = mask.reshape(B, 1, S).astype(jnp.float32)
    # Fused: p_base + attention + head concat + final linear, one kernel.
    return pallas_fused_attention(q, k, v, adj_matrix, imf_stack, mask3,
                                  params["wt_bf16"][3], params["b"][3], h, LAMBDAS)


# ---------------------------------------------------------------------------
# Pure-JAX reference (mirrors the PyTorch forward) for verification
# ---------------------------------------------------------------------------
def ref_forward(weights, biases, h, Query, Key, Value, adj, imfs, mask):
    B, S, d_model = Query.shape
    d_k = d_model // h

    def lin(x, w, b):
        return x @ w.T + b

    def proj(x, w, b):
        return lin(x, w, b).reshape(B, S, h, d_k).transpose(0, 2, 1, 3)

    q = proj(Query, weights[0], biases[0])
    k = proj(Key, weights[1], biases[1])
    v = proj(Value, weights[2], biases[2])

    mask4 = mask[:, None, None, :]
    scores = jnp.einsum("bhqd,bhkd->bhqk", q, k) / math.sqrt(d_k)
    scores = jnp.where(mask4 == 0, -MASK_NEG_INF, scores)
    p_attn = jax.nn.softmax(scores, axis=-1)

    p_imfs = []
    for m in imfs:
        mm = jnp.where(mask[:, None, :] == 0, jnp.inf, m)
        p_imfs.append(jax.nn.softmax(-mm, axis=-1)[:, None, :, :])

    p_adj = (adj / (adj.sum(-1, keepdims=True) + 1e-6))[:, None, :, :]

    p_w = (LAMBDAS[0] * p_attn + LAMBDAS[1] * p_imfs[0] + LAMBDAS[2] * p_imfs[1]
           + LAMBDAS[3] * p_imfs[2] + LAMBDAS[4] * p_imfs[3]
           + LAMBDAS[5] * p_imfs[4] + LAMBDAS[6] * p_adj)
    x = jnp.einsum("bhqk,bhkd->bhqd", p_w, v)
    x = x.transpose(0, 2, 1, 3).reshape(B, S, d_model)
    return lin(x, weights[3], biases[3])


# ---------------------------------------------------------------------------
if __name__ == "__main__":
    B, S, d_model, h = 2, 8, 32, 4

    key = jax.random.PRNGKey(0)
    keys = jax.random.split(key, 16)

    weights = [0.1 * jax.random.normal(keys[i], (d_model, d_model), jnp.float32)
               for i in range(4)]
    biases = [0.01 * jax.random.normal(keys[4 + i], (d_model,), jnp.float32)
              for i in range(4)]
    params = prepare_params(h, weights, biases)

    Query = jax.random.normal(keys[8], (B, S, d_model), jnp.float32)
    Key_in = jax.random.normal(keys[9], (B, S, d_model), jnp.float32)
    Value = jax.random.normal(keys[10], (B, S, d_model), jnp.float32)
    adj = jax.random.uniform(keys[11], (B, S, S), jnp.float32)
    imf_stack = jax.random.uniform(keys[12], (B, 5, S, S), jnp.float32)
    mask = jnp.ones((B, S), jnp.float32).at[0, S - 1].set(0.0)  # mask one key pos in batch 0

    out = ts_mha_forward(params, Query, Key_in, Value, adj, imf_stack, mask)
    out = jax.block_until_ready(out)

    ref = ref_forward(weights, biases, h, Query, Key_in, Value, adj,
                      [imf_stack[:, i] for i in range(5)], mask)
    # Tolerance accounts for bf16 MXU operands + approx reciprocal in the attn softmax.
    np.testing.assert_allclose(np.asarray(out), np.asarray(ref), rtol=3e-2, atol=3e-2)

    print("KERNEL_OK")
</pallas_src>

<mosaic_0001>
module attributes {stable_mosaic.version = 11 : i64} {
  func.func @_linear_kernel(%arg0: i32, %arg1: memref<16x32xf32, #tpu.memory_space<vmem>>, %arg2: memref<32x32xbf16, #tpu.memory_space<vmem>>, %arg3: memref<1x32xf32, #tpu.memory_space<vmem>>, %arg4: memref<16x32xbf16, #tpu.memory_space<vmem>>) attributes {dimension_semantics = [#tpu.dimension_semantics<parallel>], iteration_bounds = array<i64: 1>, scalar_prefetch = 0 : i64, scratch_operands = 0 : i64, tpu.core_type = #tpu.core_type<tc>, window_params = [{transform_indices = @transform_0, window_bounds = array<i64: 16, 32>}, {pipeline_mode = #tpu.pipeline_mode<synchronous>, transform_indices = @transform_1, window_bounds = array<i64: 32, 32>}, {pipeline_mode = #tpu.pipeline_mode<synchronous>, transform_indices = @transform_2, window_bounds = array<i64: 1, 32>}, {transform_indices = @transform_3, window_bounds = array<i64: 16, 32>}]} {
    %c0 = arith.constant 0 : index
    %c0_0 = arith.constant 0 : index
    %0 = vector.load %arg1[%c0, %c0_0] : memref<16x32xf32, #tpu.memory_space<vmem>>, vector<16x32xf32>
    %1 = arith.truncf %0 : vector<16x32xf32> to vector<16x32xbf16>
    %c0_1 = arith.constant 0 : index
    %c0_2 = arith.constant 0 : index
    %2 = vector.load %arg2[%c0_1, %c0_2] : memref<32x32xbf16, #tpu.memory_space<vmem>>, vector<32x32xbf16>
    %cst = arith.constant dense<0.000000e+00> : vector<16x32xf32>
    %3 = tpu.matmul %1, %2, %cst {dimension_numbers = #tpu.dot_dimension_numbers<[1], [0], [0], [1], [0, 0, 1, 1], [], []>} : vector<16x32xbf16>, vector<32x32xbf16>, vector<16x32xf32> -> vector<16x32xf32>
    %c0_3 = arith.constant 0 : index
    %c0_4 = arith.constant 0 : index
    %4 = vector.load %arg3[%c0_3, %c0_4] : memref<1x32xf32, #tpu.memory_space<vmem>>, vector<1x32xf32>
    %5 = vector.broadcast %4 : vector<1x32xf32> to vector<16x32xf32>
    %6 = arith.addf %3, %5 : vector<16x32xf32>
    %7 = arith.truncf %6 : vector<16x32xf32> to vector<16x32xbf16>
    %c0_5 = arith.constant 0 : index
    %c0_6 = arith.constant 0 : index
    %8 = vector.load %arg4[%c0_5, %c0_6] : memref<16x32xbf16, #tpu.memory_space<vmem>>, vector<16x32xbf16>
    tpu.vector_store %arg4[%c0_5, %c0_6], %7 {strides = array<i32>} : memref<16x32xbf16, #tpu.memory_space<vmem>>, vector<16x32xbf16>,
    return
  }
  func.func @transform_0(%arg0: i32) -> (i32, i32) {
    %c0_i32 = arith.constant 0 : i32
    %c0_i32_0 = arith.constant 0 : i32
    return %arg0, %c0_i32 : i32, i32
  }
  func.func @transform_1(%arg0: i32) -> (i32, i32) {
    %c0_i32 = arith.constant 0 : i32
    %c0_i32_0 = arith.constant 0 : i32
    %c0_i32_1 = arith.constant 0 : i32
    return %c0_i32, %c0_i32_0 : i32, i32
  }
  func.func @transform_2(%arg0: i32) -> (i32, i32) {
    %c0_i32 = arith.constant 0 : i32
    %c0_i32_0 = arith.constant 0 : i32
    %c0_i32_1 = arith.constant 0 : i32
    return %c0_i32, %c0_i32_0 : i32, i32
  }
  func.func @transform_3(%arg0: i32) -> (i32, i32) {
    %c0_i32 = arith.constant 0 : i32
    %c0_i32_0 = arith.constant 0 : i32
    return %arg0, %c0_i32 : i32, i32
  }
}

</mosaic_0001>

<bundles_post_ra>
// kernel: tpu_custom_call.1
= control target key start
LH: loop header
LB: loop body
LE: loop exit
PB: predicated region body
PF: predicated region fallthrough
CT: control target
= control target key end

     0   :  { %8 = vsyncpa [#allocation3], 0  ;;  %s320_s0 = inlined_call_operand.hbm [shape: f32[16,32], index: 0, kind: input, shape index: {}]   ;;  %s321_s1 = inlined_call_operand.hbm [shape: bf16[32,32], index: 1, kind: input, shape index: {}]   ;;  %s322_s2 = inlined_call_operand.vmem [shape: f32[1,32], index: 2, kind: input, shape index: {}]   ;;  %s323_s3 = inlined_call_operand.hbm [shape: bf16[16,32], index: 3, kind: output, shape index: {}]  }
   0x1   :  { %9 = vsyncpa [#allocation6], 0 }
   0x2   :  { %10 = vsyncpa [#allocation4], 0  ;;  %s246_s12 = smov [#allocation2]   ;;  %s174_s16 = scalar_lea.hbm %s320_s0, 256 }
   0x3   :  { %s16_s13 = sshll.u32 %s246_s12, 4  ;;  %p175_p0 = scmp.ne.s32.totalorder %s320_s0, %s174_s16  ;;  %s17_s13 = int_to_ptr.vmem [resolvable:$true] %s16_s13 }
   0x4   :  { %p178_p1 = scmp.lt.u32.totalorder %s174_s16, %s320_s0 }
   0x6   :  { %p180_p2 = pnand %p178_p1, %p175_p0 }
   0x8   :  { %183 = shalt.err (!%p180_p2)
}
   0x9   :  { %s184_s21 = scalar_lea.vmem %s17_s13, 256  ;;  %p189_p4 = scmp.lt.s32.totalorder %s17_s13, %s17_s13 }
   0xa   :  { %p185_p3 = scmp.ne.s32.totalorder %s17_s13, %s184_s21  ;;  %p190_p5 = scmp.lt.s32.totalorder %s184_s21, %s184_s21 }
   0xc   :  { %p191_p6 = por %p190_p5, %p189_p4 }
   0xe   :  { %p192_p7 = pnand %p191_p6, %p185_p3 }
  0x10   :  { %195 = shalt.err (!%p192_p7)
}
  0x11   :  { %s247_s22 = smov 128   ;;  %s248_s23 = smov 8  }
  0x12   :  { %22 = dma.hbm_to_vmem [thread:$0]  %s320_s0, 256, %s17_s13, [#allocation3], %s247_s22, %s247_s22, %s248_s23  }
  0x13   :  { %s249_s26 = smov [#allocation5]   ;;  %s196_s30 = scalar_lea.hbm %s321_s1, 256 }
  0x14   :  { %s28_s27 = sshll.u32 %s249_s26, 4  ;;  %p197_p8 = scmp.ne.s32.totalorder %s321_s1, %s196_s30  ;;  %s29_s27 = int_to_ptr.vmem [resolvable:$true] %s28_s27 }
  0x15   :  { %p200_p9 = scmp.lt.u32.totalorder %s196_s30, %s321_s1 }
  0x17   :  { %p202_p10 = pnand %p200_p9, %p197_p8 }
  0x19   :  { %205 = shalt.err (!%p202_p10)
}
  0x1a   :  { %s206_s8 = scalar_lea.vmem %s29_s27, 256  ;;  %p211_p12 = scmp.lt.s32.totalorder %s29_s27, %s29_s27 }
  0x1b   :  { %p207_p11 = scmp.ne.s32.totalorder %s29_s27, %s206_s8  ;;  %p212_p13 = scmp.lt.s32.totalorder %s206_s8, %s206_s8 }
  0x1d   :  { %p213_p0 = por %p212_p13, %p211_p12 }
  0x1f   :  { %p214_p1 = pnand %p213_p0, %p207_p11 }
  0x21   :  { %217 = shalt.err (!%p214_p1)
}
  0x22   :  { %s250_s0 = smov 64   ;;  %s251_s9 = smov 4  }
  0x23   :  { %34 = dma.hbm_to_vmem [thread:$0]  %s321_s1, 256, %s29_s27, [#allocation6], %s250_s0, %s250_s0, %s251_s9  }
  0x24   :  { %240 = dma.done.wait [#allocation3], 256  }
  0x25   :  { %241 = vsyncadd [#allocation3], 4294967040 }
  0x26   :  { %242 = dma.done.wait [#allocation6], 256  }
  0x27   :  { %243 = vsyncadd [#allocation6], 4294967040  ;;  %v252_v0 = vmov 0.0   ;;  %vm253_vm0 = vmmov 0   ;;  %v172_v1 = vld [vmem:[#allocation5] sm:$0xff]   ;;  %v173_v2 = vld [vmem:[#allocation5 + $0x8] sm:$0xff]  }
  0x28   :  { %155 = vmatprep.subr.bf16.mxu0 %v252_v0  ;;  %159 = vmatprep.mubr.msk.bf16.mxu0 %vm253_vm0, %v252_v0  ;;  %v44_v3 = vld [vmem:[#allocation2] sm:$0xff]  ;;  %v45_v4 = vld [vmem:[#allocation2 + $0x8] sm:$0xff]  ;;  %vm70_vm1 = vcmask 261120   ;;  %vm123_vm2 = vcmask 257024   ;;  %s254_s13 = smov [#allocation7]  }
  0x29   :  { %156 = vmatpush3.bf16.msra.mxu0 %v172_v1  ;;  %v46_v5 = vpack.c.bf16 %v45_v4, %v44_v3  ;;  %v144_v6 = vld [vmem:[%s322_s2] ss:$0 sm:$0xff]  ;;  %s131_s14 = sshll.u32 %s254_s13, 4  ;;  %s132_s14 = int_to_ptr.vmem [resolvable:$true] %s131_s14 }
  0x2a   :  { %157 = vmatprep.subr.bf16.mxu0 %v252_v0  ;;  %s218_s15 = scalar_lea.vmem %s132_s14, 128  ;;  %p223_p3 = scmp.lt.s32.totalorder %s132_s14, %s132_s14 }
  0x2b   :  { %p219_p2 = scmp.ne.s32.totalorder %s132_s14, %s218_s15  ;;  %p224_p4 = scmp.lt.s32.totalorder %s218_s15, %s218_s15 }
  0x2d   :  { %158 = vmatpush3.bf16.msra.mxu0 %v173_v2  ;;  %p225_p5 = por %p224_p4, %p223_p3 }
  0x2f   :  { %p226_p6 = pnand %p225_p5, %p219_p2 }
  0x30   :  { %160 = vmatmul.mubr.msk.bf16.vlgmr.msra.gmra.mrb[0].mxu0 %vm70_vm1, %v46_v5 }
 0x103   :  { %v108_v7 = vpop.f32.mrb[0].mxu0 }
 0x104   :  { %v109_v8 = vadd.f32 %v144_v6, %v108_v7  ;;  %v161_v9 = vpop.f32.mrb[1].mxu0 }
 0x105   :  { %v111_v10 = vpop.f32.mrb[2].mxu0 }
 0x106   :  { %v150_v11 = vpack.c.bf16 %v109_v8, %v109_v8  ;;  %v112_v12 = vadd.f32 %v144_v6, %v111_v10  ;;  %v162_v13 = vpop.f32.mrb[3].mxu0 }
 0x108   :  { %v151_v14 = vpack.c.bf16 %v112_v12, %v112_v12  ;;  %124 = vst.msk [vmem:[#allocation7] sm:$0xf] %vm123_vm2, %v150_v11 }
 0x10a   :  { %125 = vst.msk [vmem:[#allocation7 + $0x4] sm:$0xf] %vm123_vm2, %v151_v14 }
 0x10b   :  { %229 = shalt.err (!%p226_p6)
}
 0x10c   :  { %s230_s17 = scalar_lea.hbm %s323_s3, 128 }
 0x10d   :  { %p231_p7 = scmp.ne.s32.totalorder %s323_s3, %s230_s17  ;;  %p234_p8 = scmp.lt.u32.totalorder %s230_s17, %s323_s3 }
 0x10f   :  { %p236_p9 = pnand %p234_p8, %p231_p7 }
 0x111   :  { %239 = shalt.err (!%p236_p9)
}
 0x112   :  { %137 = dma.vmem_to_hbm [thread:$0]  %s132_s14, 128, %s323_s3, [#allocation4], %s250_s0, %s250_s0, %s251_s9  }
 0x113   :  { %244 = dma.done.wait [#allocation4], 128  }
 0x114   :  { %245 = vsyncadd [#allocation4], 4294967168 }
 0x115   :  { %141 = vsyncpa [#allocation3], 1 }
 0x116   :  { %142 = vsyncpa [#allocation6], 1 }
 0x117   :  { %143 = vsyncpa [#allocation4], 1 }

</bundles_post_ra>
